<compile_context>
chip_gen: v5e
topology: v5e:2x2
jax: 0.10.0
libtpu: 0.0.40
codegen_flags: <defaults>
</compile_context>

<pallas_src>
import functools

import jax
import jax.numpy as jnp
from jax import lax
from jax.experimental import pallas as pl
from jax.experimental.pallas import tpu as pltpu

LANE = 128      # lane (last-dim) granularity
SUBLANE = 8     # f32 sublane granularity


def _round_up(x, m):
    return ((x + m - 1) // m) * m


def classifier_kernel(idx_ref, mt_ref, out_ref, *, bias_row):
    # idx_ref: (1, TN)   int32   -- token ids for this tile (tokens on lanes)
    # mt_ref:  (Cp, Kp)  float32 -- fused, transposed table (E @ W^T)^T with
    #                               fc_bias folded into column `bias_row`
    # out_ref: (Cp, TN)  float32 -- transposed logits tile (classes on
    #                               sublanes, tokens on lanes -> dense vst)
    idx = idx_ref[...]                                    # (1, TN)
    cp, kp = mt_ref.shape
    tn = out_ref.shape[1]

    # One-hot^T selector (exact 0/1 values) with a constant 1 in the reserved
    # bias row, so the single matmul performs the row-gather AND the bias add.
    row = lax.broadcasted_iota(jnp.int32, (kp, tn), 0)
    sel = jnp.logical_or(row == idx, row == bias_row).astype(jnp.float32)

    # logits^T = M^T (Cp,Kp) @ onehot^T (Kp,TN)  -- one fused MXU matmul.
    out_ref[...] = jnp.dot(mt_ref[...], sel,
                           preferred_element_type=jnp.float32)


def classifier_forward(x, emb_table, fc_weight, fc_bias, *,
                       tile_n=2048, use_pallas=None):
    """x: int array (B, S); returns logits (B, S, n_ops) in float32."""
    B, S = x.shape
    n_ops, emb_dim = emb_table.shape
    N = B * S

    # Size gating: a single-step pallas_call is launch/DMA-setup dominated;
    # below a few thousand tokens plain XLA is strictly faster.
    if use_pallas is None:
        use_pallas = N >= 4096
    if not use_pallas:
        return (jnp.take(emb_table, x, axis=0)
                @ fc_weight.astype(jnp.float32).T
                + fc_bias.astype(jnp.float32))

    # ---- one-time algebraic fusion: M = E @ W^T, bias folded into M^T ----
    M = jnp.dot(emb_table.astype(jnp.float32),
                fc_weight.astype(jnp.float32).T,
                precision=lax.Precision.HIGHEST)          # (n_ops, n_ops)

    kp = _round_up(n_ops + 1, SUBLANE)   # one-hot rows (>= n_ops + 1 for bias)
    cp = _round_up(n_ops, SUBLANE)       # classes padded to sublane multiple
    bias_row = kp - 1                    # >= n_ops, never a valid token id
    MT = jnp.zeros((cp, kp), jnp.float32)
    MT = MT.at[:n_ops, :n_ops].set(M.T)
    MT = MT.at[:n_ops, bias_row].set(fc_bias.astype(jnp.float32))

    # ---- tile the token dimension on the lane axis ----
    tn_cap = max(LANE, _round_up(tile_n, LANE))
    # Aim for >= 2 grid steps when N allows it (lets v7x use both TCs).
    tn = max(LANE, min(tn_cap, _round_up(pl.cdiv(N, 2), LANE)))
    n_pad = _round_up(N, tn)
    idx = jnp.zeros((1, n_pad), jnp.int32).at[0, :N].set(
        x.reshape(N).astype(jnp.int32))

    grid = (n_pad // tn,)
    kernel = functools.partial(classifier_kernel, bias_row=bias_row)
    out_t = pl.pallas_call(
        kernel,
        out_shape=jax.ShapeDtypeStruct((cp, n_pad), jnp.float32),
        grid=grid,
        in_specs=[
            pl.BlockSpec((1, tn), lambda i: (0, i)),    # token ids (pipelined)
            pl.BlockSpec((cp, kp), lambda i: (0, 0)),   # fused table (resident)
        ],
        out_specs=pl.BlockSpec((cp, tn), lambda i: (0, i)),
        compiler_params=pltpu.CompilerParams(
            dimension_semantics=("parallel",)),
    )(idx, MT)

    # Contiguous row slice of the narrow (16, N_pad) result, then a tiny
    # (n_ops, N) transpose back to the reference layout.
    return out_t[:n_ops, :N].T.reshape(B, S, n_ops)


if __name__ == "__main__":
    # Classifier(n_ops, emb_dim=16): Embedding(n_ops, 16) -> Linear(16, n_ops)
    n_ops = 10
    emb_dim = 16
    B, S = 4, 8

    key = jax.random.PRNGKey(0)
    k_idx, k_emb, k_w, k_b = jax.random.split(key, 4)

    # Deterministic parameter init (PyTorch-like distributions).
    emb_table = jax.random.normal(k_emb, (n_ops, emb_dim), dtype=jnp.float32)
    bound = 1.0 / jnp.sqrt(emb_dim)
    fc_weight = jax.random.uniform(k_w, (n_ops, emb_dim), dtype=jnp.float32,
                                   minval=-bound, maxval=bound)
    fc_bias = jax.random.uniform(k_b, (n_ops,), dtype=jnp.float32,
                                 minval=-bound, maxval=bound)

    # Integer token-id inputs.
    x = jax.random.randint(k_idx, (B, S), 0, n_ops, dtype=jnp.int32)

    # Force the Pallas path so the kernel is exercised at this small size.
    logits = classifier_forward(x, emb_table, fc_weight, fc_bias,
                                use_pallas=True)
    logits = jax.block_until_ready(logits)

    # Pure-JAX reference of the original forward semantics.
    ref = (jnp.take(emb_table, x, axis=0)
           @ fc_weight.T + fc_bias)
    assert logits.shape == (B, S, n_ops)
    assert jnp.allclose(logits, ref, atol=1e-4, rtol=1e-4)

    print("KERNEL_OK")
</pallas_src>

<mosaic_0001>
module attributes {stable_mosaic.version = 11 : i64} {
  func.func @classifier_kernel(%arg0: i32, %arg1: memref<1x128xi32, #tpu.memory_space<vmem>>, %arg2: memref<16x16xf32, #tpu.memory_space<vmem>>, %arg3: memref<16x128xf32, #tpu.memory_space<vmem>>) attributes {dimension_semantics = [#tpu.dimension_semantics<parallel>], iteration_bounds = array<i64: 1>, scalar_prefetch = 0 : i64, scratch_operands = 0 : i64, tpu.core_type = #tpu.core_type<tc>, window_params = [{transform_indices = @transform_0, window_bounds = array<i64: 1, 128>}, {pipeline_mode = #tpu.pipeline_mode<synchronous>, transform_indices = @transform_1, window_bounds = array<i64: 16, 16>}, {transform_indices = @transform_2, window_bounds = array<i64: 16, 128>}]} {
    %c0 = arith.constant 0 : index
    %c0_0 = arith.constant 0 : index
    %0 = vector.load %arg1[%c0, %c0_0] : memref<1x128xi32, #tpu.memory_space<vmem>>, vector<1x128xi32>
    %1 = tpu.iota {dimensions = array<i32: 0>} : vector<16x128xi32>
    %2 = vector.broadcast %0 : vector<1x128xi32> to vector<16x128xi32>
    %3 = arith.cmpi eq, %1, %2 : vector<16x128xi32>
    %c15_i32 = arith.constant 15 : i32
    %4 = vector.broadcast %c15_i32 : i32 to vector<16x128xi32>
    %5 = arith.cmpi eq, %1, %4 : vector<16x128xi32>
    %6 = arith.ori %3, %5 : vector<16x128xi1>
    %7 = arith.extui %6 : vector<16x128xi1> to vector<16x128xi32>
    %8 = arith.sitofp %7 : vector<16x128xi32> to vector<16x128xf32>
    %c0_1 = arith.constant 0 : index
    %c0_2 = arith.constant 0 : index
    %9 = vector.load %arg2[%c0_1, %c0_2] : memref<16x16xf32, #tpu.memory_space<vmem>>, vector<16x16xf32>
    %cst = arith.constant dense<0.000000e+00> : vector<16x128xf32>
    %10 = tpu.matmul %9, %8, %cst {dimension_numbers = #tpu.dot_dimension_numbers<[1], [0], [0], [1], [0, 0, 1, 1], [], []>} : vector<16x16xf32>, vector<16x128xf32>, vector<16x128xf32> -> vector<16x128xf32>
    %c0_3 = arith.constant 0 : index
    %c0_4 = arith.constant 0 : index
    %11 = vector.load %arg3[%c0_3, %c0_4] : memref<16x128xf32, #tpu.memory_space<vmem>>, vector<16x128xf32>
    tpu.vector_store %arg3[%c0_3, %c0_4], %10 {strides = array<i32>} : memref<16x128xf32, #tpu.memory_space<vmem>>, vector<16x128xf32>,
    return
  }
  func.func @transform_0(%arg0: i32) -> (i32, i32) {
    %c0_i32 = arith.constant 0 : i32
    %c0_i32_0 = arith.constant 0 : i32
    return %c0_i32, %arg0 : i32, i32
  }
  func.func @transform_1(%arg0: i32) -> (i32, i32) {
    %c0_i32 = arith.constant 0 : i32
    %c0_i32_0 = arith.constant 0 : i32
    %c0_i32_1 = arith.constant 0 : i32
    return %c0_i32, %c0_i32_0 : i32, i32
  }
  func.func @transform_2(%arg0: i32) -> (i32, i32) {
    %c0_i32 = arith.constant 0 : i32
    %c0_i32_0 = arith.constant 0 : i32
    return %c0_i32, %arg0 : i32, i32
  }
}

</mosaic_0001>

<bundles_post_ra>
// kernel: tpu_custom_call.1
= control target key start
LH: loop header
LB: loop body
LE: loop exit
PB: predicated region body
PF: predicated region fallthrough
CT: control target
= control target key end

     0   :  { %7 = vsyncpa [#allocation3], 0  ;;  %s240_s0 = inlined_call_operand.hbm [shape: s32[1,128], index: 0, kind: input, shape index: {}]   ;;  %s241_s1 = inlined_call_operand.hbm [shape: f32[16,16], index: 1, kind: input, shape index: {}]   ;;  %s242_s2 = inlined_call_operand.hbm [shape: f32[16,128], index: 2, kind: output, shape index: {}]  }
   0x1   :  { %8 = vsyncpa [#allocation6], 0 }
   0x2   :  { %9 = vsyncpa [#allocation4], 0  ;;  %s15_s11 = sshll.u32 %s240_s0, 4  ;;  %s204_s12 = smov [#allocation2]   ;;  %s16_s11 = int_to_ptr.hbm [resolvable:$true] %s15_s11 }
   0x3   :  { %s17_s13 = sshll.u32 %s204_s12, 4  ;;  %s25_s16 = sshll.u32 %s241_s1, 4  ;;  %s18_s13 = int_to_ptr.vmem [resolvable:$true] %s17_s13  ;;  %s26_s16 = int_to_ptr.hbm [resolvable:$true] %s25_s16 }
   0x4   :  { %20 = dma.hbm_to_vmem [thread:$0]  %s16_s11, 16, %s18_s13, [#allocation3]  }
   0x5   :  { %s205_s17 = smov [#allocation5]   ;;  %s206_s19 = smov 128  }
   0x6   :  { %s27_s18 = sshll.u32 %s205_s17, 4  ;;  %s207_s20 = smov 8   ;;  %s28_s18 = int_to_ptr.vmem [resolvable:$true] %s27_s18 }
   0x7   :  { %33 = dma.hbm_to_vmem [thread:$0]  %s26_s16, 256, %s28_s18, [#allocation6], %s206_s19, %s206_s19, %s207_s20  }
   0x8   :  { %198 = dma.done.wait [#allocation3], 16  }
   0x9   :  { %199 = vsyncadd [#allocation3], 4294967280 }
   0xa   :  { %200 = dma.done.wait [#allocation6], 256  }
   0xb   :  { %201 = vsyncadd [#allocation6], 4294967040  ;;  %v43_v0 = vlaneseq  ;;  %v125_v3 = vld [vmem:[#allocation2] ss:$0 sm:$0xff]  ;;  %v208_v4 = vmov 1.0   ;;  %v57_v5 = vld [vmem:[#allocation5] sm:$0xff] }
   0xc   :  { %vm59_vm4 = vcmask 130048   ;;  %v58_v6 = vld [vmem:[#allocation5 + $0x8] sm:$0xff]  ;;  %s209_s0 = smov [#allocation7]   ;;  %s97_s23 = sshll.u32 %s242_s2, 4  ;;  %s98_s23 = int_to_ptr.hbm [resolvable:$true] %s97_s23 }
   0xd   :  { %v44_v1 = vshrl.u32 %v43_v0, 7  ;;  %s95_s1 = sshll.u32 %s209_s0, 4  ;;  %s96_s1 = int_to_ptr.vmem [resolvable:$true] %s95_s1 }
   0xf   :  { %v45_v2 = vadd.s32 8, %v44_v1  ;;  %vm47_vm3 = vcmp.eq.s32.totalorder %v44_v1, %v125_v3 }
  0x11   :  { %vm50_vm0 = vcmp.eq.s32.totalorder %v45_v2, 15  ;;  %vm48_vm1 = vcmp.eq.s32.totalorder %v45_v2, %v125_v3 }
  0x12   :  { %vm52_vm2 = vmor %vm48_vm1, %vm50_vm0 }
  0x13   :  { %113 = vmatpush.msk.msra.mxu0 %vm52_vm2, %v208_v4  ;;  %117 = vmatpush.msk.msra.mxu1 %vm52_vm2, %v208_v4 }
  0x15   :  { %114 = vmatpush.msk.msra.mxu0 %vm47_vm3, %v208_v4  ;;  %118 = vmatpush.msk.msra.mxu1 %vm47_vm3, %v208_v4 }
  0x16   :  { %115 = vmatmul.msk.f32.vlgmr.msra.gmra.mxu0 %vm59_vm4, %v57_v5  ;;  %116 = vmatmul.msk.f32.vlgmr.msra.gmra.mxu1 %vm59_vm4, %v58_v6 }
  0x93   :  { %v83_v7 = vpop.f32.mrf.mxu0  ;;  %v86_v8 = vpop.f32.mrf.mxu1 }
  0x94   :  { %89 = vst [vmem:[#allocation7] sm:$0xff] %v83_v7 }
  0x95   :  { %90 = vst [vmem:[#allocation7 + $0x8] sm:$0xff] %v86_v8 }
  0x96   :  { %103 = dma.vmem_to_hbm [thread:$0]  %s96_s1, 256, %s98_s23, [#allocation4], %s206_s19, %s206_s19, %s207_s20  }
  0x97   :  { %202 = dma.done.wait [#allocation4], 256  }
  0x98   :  { %203 = vsyncadd [#allocation4], 4294967040 }
  0x99   :  { %108 = vsyncpa [#allocation3], 1 }
  0x9a   :  { %109 = vsyncpa [#allocation6], 1 }
  0x9b   :  { %110 = vsyncpa [#allocation4], 1 }

</bundles_post_ra>
